<compile_context>
chip_gen: v6e
topology: v6e:2x2x1
jax: 0.10.0
libtpu: 0.0.40
codegen_flags: <defaults>
</compile_context>

<pallas_src>
import math
from functools import partial

import jax
import jax.numpy as jnp
from jax.experimental import pallas as pl
from jax.experimental.pallas import tpu as pltpu


def _round_up(v, m):
    return ((v + m - 1) // m) * m


# ---------------------------------------------------------------------------
# Kernel variant A ("linear first"):  out = relu(G @ (x @ W^T + b)) [* mask]
#   grid = (n_col_tiles, n_row_tiles)  -- row axis innermost ("arbitrary")
#   h = x @ W^T + b is computed once per column tile into VMEM scratch and
#   reused for every G row tile.
# ---------------------------------------------------------------------------
def _lin_first_kernel(*refs, apply_mask):
    if apply_mask:
        x_ref, wT_ref, b_ref, g_ref, m_ref, o_ref, h_ref = refs
    else:
        x_ref, wT_ref, b_ref, g_ref, o_ref, h_ref = refs

    @pl.when(pl.program_id(1) == 0)
    def _():
        h = jnp.dot(x_ref[...], wT_ref[...], preferred_element_type=jnp.float32)
        h = h + b_ref[...]                      # bias stays f32
        h_ref[...] = h.astype(h_ref.dtype)      # stored at compute dtype

    acc = jnp.dot(g_ref[...], h_ref[...], preferred_element_type=jnp.float32)
    acc = jnp.maximum(acc, 0.0)
    if apply_mask:
        acc = acc * m_ref[...]
    o_ref[...] = acc.astype(o_ref.dtype)


# ---------------------------------------------------------------------------
# Kernel variant B ("propagate first", used when in_dim < out_dim):
#   out = relu((G @ x) @ W^T + rowsum(G)[:, None] * b) [* mask]
#   grid = (n_row_tiles, n_col_tiles)  -- column axis innermost ("arbitrary")
#   gx = G_rows @ x and rowsum(G_rows) are computed once per row tile into
#   VMEM scratch and reused for every output-column tile.
# ---------------------------------------------------------------------------
def _prop_first_kernel(*refs, apply_mask):
    if apply_mask:
        x_ref, wT_ref, b_ref, g_ref, m_ref, o_ref, gx_ref, gs_ref = refs
    else:
        x_ref, wT_ref, b_ref, g_ref, o_ref, gx_ref, gs_ref = refs

    @pl.when(pl.program_id(1) == 0)
    def _():
        g = g_ref[...]
        gx = jnp.dot(g, x_ref[...], preferred_element_type=jnp.float32)
        gx_ref[...] = gx.astype(gx_ref.dtype)
        gs_ref[...] = jnp.sum(g.astype(jnp.float32), axis=1, keepdims=True)

    acc = jnp.dot(gx_ref[...], wT_ref[...], preferred_element_type=jnp.float32)
    acc = acc + gs_ref[...] * b_ref[...]        # rowsum(G) * bias, f32
    acc = jnp.maximum(acc, 0.0)
    if apply_mask:
        acc = acc * m_ref[...]
    o_ref[...] = acc.astype(o_ref.dtype)


def _hgnn_layer(x, G, wT, b, mask, *, prop_first, tm, tn, vmem_limit):
    """One fused layer: relu(G @ (x @ wT + b)) [* mask]. Inputs pre-padded:
       x (Np, Din), G (Np, Np), wT (Din, Dout), b (1, Dout) f32,
       mask (Np, Dout) f32 or None.  Np % tm == 0, Dout % tn == 0."""
    Np, Din = x.shape
    Dout = wT.shape[1]
    n_rows = Np // tm
    n_cols = Dout // tn
    apply_mask = mask is not None

    if prop_first:
        grid = (n_rows, n_cols)                      # columns innermost
        x_spec = pl.BlockSpec((Np, Din), lambda i, j: (0, 0))
        wT_spec = pl.BlockSpec((Din, tn), lambda i, j: (0, j))
        b_spec = pl.BlockSpec((1, tn), lambda i, j: (0, j))
        g_spec = pl.BlockSpec((tm, Np), lambda i, j: (i, 0))
        m_spec = pl.BlockSpec((tm, tn), lambda i, j: (i, j))
        o_spec = pl.BlockSpec((tm, tn), lambda i, j: (i, j))
        scratch = [pltpu.VMEM((tm, Din), x.dtype),   # gx = G_rows @ x
                   pltpu.VMEM((tm, 1), jnp.float32)]  # rowsum(G_rows)
        kernel = partial(_prop_first_kernel, apply_mask=apply_mask)
    else:
        grid = (n_cols, n_rows)                      # rows innermost
        x_spec = pl.BlockSpec((Np, Din), lambda j, i: (0, 0))
        wT_spec = pl.BlockSpec((Din, tn), lambda j, i: (0, j))
        b_spec = pl.BlockSpec((1, tn), lambda j, i: (0, j))
        g_spec = pl.BlockSpec((tm, Np), lambda j, i: (i, 0))
        m_spec = pl.BlockSpec((tm, tn), lambda j, i: (i, j))
        o_spec = pl.BlockSpec((tm, tn), lambda j, i: (i, j))
        scratch = [pltpu.VMEM((Np, tn), x.dtype)]    # h = x @ wT + b
        kernel = partial(_lin_first_kernel, apply_mask=apply_mask)

    in_specs = [x_spec, wT_spec, b_spec, g_spec]
    args = [x, wT, b, G]
    if apply_mask:
        in_specs.append(m_spec)
        args.append(mask)

    return pl.pallas_call(
        kernel,
        out_shape=jax.ShapeDtypeStruct((Np, Dout), x.dtype),
        grid_spec=pltpu.PrefetchScalarGridSpec(
            num_scalar_prefetch=0,
            grid=grid,
            in_specs=in_specs,
            out_specs=o_spec,
            scratch_shapes=scratch,
        ),
        compiler_params=pltpu.CompilerParams(
            dimension_semantics=("parallel", "arbitrary"),
            vmem_limit_bytes=vmem_limit,
        ),
    )(*args)


def double_layer_hgnn_conv(x, G, w1, b1, w2, b2, *,
                           dropout_p=0.5, dropout_mask=None,
                           tm=256, tn=256, vmem_limit=48 * 1024 * 1024):
    """Forward of double_layer_HGNN_conv.

    x:  (N, in_ft)       G: (N, N)
    w1: (out_ft, in_ft)  b1: (out_ft,)
    w2: (in_ft, out_ft)  b2: (in_ft,)
    dropout_mask: optional (N, out_ft) 0/1 keep mask (dropout skipped if None).
    Returns (N, in_ft).
    """
    N, in_ft = x.shape
    out_ft = w1.shape[0]
    assert G.shape == (N, N)
    assert w1.shape == (out_ft, in_ft) and w2.shape == (in_ft, out_ft)
    dtype = x.dtype

    # ----- pad to hardware-friendly tiles (sublane 8 / lane 128 / tiles) ----
    r8 = _round_up(N, 8)
    tm_eff = min(tm, r8)
    Np = _round_up(r8, tm_eff)

    in_p = _round_up(in_ft, 128)
    out_p = _round_up(out_ft, 128)
    tn1 = min(tn, out_p)           # layer-1 output column tile
    out_p = _round_up(out_p, tn1)
    tn2 = min(tn, in_p)            # layer-2 output column tile
    in_p = _round_up(in_p, tn2)

    xp = jnp.zeros((Np, in_p), dtype).at[:N, :in_ft].set(x.astype(dtype))
    Gp = jnp.zeros((Np, Np), dtype).at[:N, :N].set(G.astype(dtype))

    w1T = jnp.zeros((in_p, out_p), dtype).at[:in_ft, :out_ft].set(w1.T.astype(dtype))
    b1p = jnp.zeros((1, out_p), jnp.float32).at[0, :out_ft].set(b1.astype(jnp.float32))
    w2T = jnp.zeros((out_p, in_p), dtype).at[:out_ft, :in_ft].set(w2.T.astype(dtype))
    b2p = jnp.zeros((1, in_p), jnp.float32).at[0, :in_ft].set(b2.astype(jnp.float32))

    if dropout_mask is not None and dropout_p > 0.0:
        scale = 1.0 / (1.0 - dropout_p)
        maskp = jnp.zeros((Np, out_p), jnp.float32)
        maskp = maskp.at[:N, :out_ft].set(dropout_mask.astype(jnp.float32) * scale)
    else:
        maskp = None

    # ----- layer 1: relu(G @ (x @ W1^T + b1)) * dropout_mask ----------------
    y1 = _hgnn_layer(xp, Gp, w1T, b1p, maskp,
                     prop_first=(in_p < out_p),
                     tm=tm_eff, tn=tn1, vmem_limit=vmem_limit)

    # ----- layer 2: relu(G @ (y1 @ W2^T + b2)) ------------------------------
    y2 = _hgnn_layer(y1, Gp, w2T, b2p, None,
                     prop_first=(out_p < in_p),
                     tm=tm_eff, tn=tn2, vmem_limit=vmem_limit)

    return y2[:N, :in_ft]


if __name__ == "__main__":
    # Small shapes consistent with the module: N nodes, in_ft -> out_ft -> in_ft.
    N, in_ft, out_ft = 16, 32, 256
    p = 0.5

    key = jax.random.PRNGKey(0)
    k_x, k_g, k_w1, k_w2, k_d = jax.random.split(key, 5)

    x = jax.random.normal(k_x, (N, in_ft), dtype=jnp.float32)
    G = jax.random.normal(k_g, (N, N), dtype=jnp.float32)

    # reset_parameters(): weights ~ Normal(0, stdv), biases = 0,
    # stdv = 1 / sqrt(linear1.weight.size(1)) = 1 / sqrt(in_ft).
    stdv = 1.0 / math.sqrt(in_ft)
    w1 = stdv * jax.random.normal(k_w1, (out_ft, in_ft), dtype=jnp.float32)
    b1 = jnp.zeros((out_ft,), dtype=jnp.float32)
    w2 = stdv * jax.random.normal(k_w2, (in_ft, out_ft), dtype=jnp.float32)
    b2 = jnp.zeros((in_ft,), dtype=jnp.float32)

    # Deterministic dropout keep-mask (F.dropout default is training=True).
    keep = jax.random.bernoulli(k_d, 1.0 - p, (N, out_ft)).astype(jnp.float32)

    out = double_layer_hgnn_conv(x, G, w1, b1, w2, b2,
                                 dropout_p=p, dropout_mask=keep)
    out = jax.block_until_ready(out)

    # Pure-JAX reference (same dropout mask).
    y1 = jnp.maximum(G @ (x @ w1.T + b1), 0.0)
    y1 = y1 * keep / (1.0 - p)
    ref = jnp.maximum(G @ (y1 @ w2.T + b2), 0.0)

    assert out.shape == (N, in_ft)
    assert jnp.allclose(out, ref, atol=1e-4, rtol=1e-4), "mismatch vs reference"

    print("KERNEL_OK")
</pallas_src>

<mosaic_0001>
module attributes {stable_mosaic.version = 11 : i64} {
  func.func @_prop_first_kernel(%arg0: i32, %arg1: i32, %arg2: memref<16x128xf32, #tpu.memory_space<vmem>>, %arg3: memref<128x256xf32, #tpu.memory_space<vmem>>, %arg4: memref<1x256xf32, #tpu.memory_space<vmem>>, %arg5: memref<16x16xf32, #tpu.memory_space<vmem>>, %arg6: memref<16x256xf32, #tpu.memory_space<vmem>>, %arg7: memref<16x256xf32, #tpu.memory_space<vmem>>, %arg8: memref<16x128xf32, #tpu.memory_space<vmem>>, %arg9: memref<16x1xf32, #tpu.memory_space<vmem>>) attributes {dimension_semantics = [#tpu.dimension_semantics<parallel>, #tpu.dimension_semantics<arbitrary>], iteration_bounds = array<i64: 1, 1>, scalar_prefetch = 0 : i64, scratch_operands = 2 : i64, tpu.core_type = #tpu.core_type<tc>, window_params = [{pipeline_mode = #tpu.pipeline_mode<synchronous>, transform_indices = @transform_0, window_bounds = array<i64: 16, 128>}, {transform_indices = @transform_1, window_bounds = array<i64: 128, 256>}, {transform_indices = @transform_2, window_bounds = array<i64: 1, 256>}, {transform_indices = @transform_3, window_bounds = array<i64: 16, 16>}, {transform_indices = @transform_4, window_bounds = array<i64: 16, 256>}, {transform_indices = @transform_5, window_bounds = array<i64: 16, 256>}]} {
    %c0_i32 = arith.constant 0 : i32
    %0 = arith.cmpi eq, %arg1, %c0_i32 : i32
    %1 = arith.extui %0 : i1 to i32
    %c0_i32_0 = arith.constant 0 : i32
    %2 = arith.cmpi ne, %1, %c0_i32_0 : i32
    scf.if %2 {
      %c0_13 = arith.constant 0 : index
      %c0_14 = arith.constant 0 : index
      %17 = vector.load %arg5[%c0_13, %c0_14] : memref<16x16xf32, #tpu.memory_space<vmem>>, vector<16x16xf32>
      %c0_15 = arith.constant 0 : index
      %c0_16 = arith.constant 0 : index
      %18 = vector.load %arg2[%c0_15, %c0_16] : memref<16x128xf32, #tpu.memory_space<vmem>>, vector<16x128xf32>
      %cst_17 = arith.constant dense<0.000000e+00> : vector<16x128xf32>
      %19 = tpu.matmul %17, %18, %cst_17 {dimension_numbers = #tpu.dot_dimension_numbers<[1], [0], [0], [1], [0, 0, 1, 1], [], []>} : vector<16x16xf32>, vector<16x128xf32>, vector<16x128xf32> -> vector<16x128xf32>
      %c0_18 = arith.constant 0 : index
      %c0_19 = arith.constant 0 : index
      %20 = vector.load %arg8[%c0_18, %c0_19] : memref<16x128xf32, #tpu.memory_space<vmem>>, vector<16x128xf32>
      tpu.vector_store %arg8[%c0_18, %c0_19], %19 {strides = array<i32>} : memref<16x128xf32, #tpu.memory_space<vmem>>, vector<16x128xf32>,
      %cst_20 = arith.constant dense<0.000000e+00> : vector<16xf32>
      %21 = vector.multi_reduction <add>, %17, %cst_20 [1] : vector<16x16xf32> to vector<16xf32>
      %22 = vector.shape_cast %21 : vector<16xf32> to vector<16x1xf32>
      %c0_21 = arith.constant 0 : index
      %c0_22 = arith.constant 0 : index
      %23 = vector.load %arg9[%c0_21, %c0_22] : memref<16x1xf32, #tpu.memory_space<vmem>>, vector<16x1xf32>
      tpu.vector_store %arg9[%c0_21, %c0_22], %22 {strides = array<i32>} : memref<16x1xf32, #tpu.memory_space<vmem>>, vector<16x1xf32>,
    } else {
    }
    %c0 = arith.constant 0 : index
    %c0_1 = arith.constant 0 : index
    %3 = vector.load %arg8[%c0, %c0_1] : memref<16x128xf32, #tpu.memory_space<vmem>>, vector<16x128xf32>
    %c0_2 = arith.constant 0 : index
    %c0_3 = arith.constant 0 : index
    %4 = vector.load %arg3[%c0_2, %c0_3] : memref<128x256xf32, #tpu.memory_space<vmem>>, vector<128x256xf32>
    %cst = arith.constant dense<0.000000e+00> : vector<16x256xf32>
    %5 = tpu.matmul %3, %4, %cst {dimension_numbers = #tpu.dot_dimension_numbers<[1], [0], [0], [1], [0, 0, 1, 1], [], []>} : vector<16x128xf32>, vector<128x256xf32>, vector<16x256xf32> -> vector<16x256xf32>
    %c0_4 = arith.constant 0 : index
    %c0_5 = arith.constant 0 : index
    %6 = vector.load %arg9[%c0_4, %c0_5] : memref<16x1xf32, #tpu.memory_space<vmem>>, vector<16x1xf32>
    %c0_6 = arith.constant 0 : index
    %c0_7 = arith.constant 0 : index
    %7 = vector.load %arg4[%c0_6, %c0_7] : memref<1x256xf32, #tpu.memory_space<vmem>>, vector<1x256xf32>
    %8 = vector.broadcast %6 : vector<16x1xf32> to vector<16x256xf32>
    %9 = vector.broadcast %7 : vector<1x256xf32> to vector<16x256xf32>
    %10 = arith.mulf %8, %9 : vector<16x256xf32>
    %11 = arith.addf %5, %10 : vector<16x256xf32>
    %cst_8 = arith.constant 0.000000e+00 : f32
    %12 = vector.broadcast %cst_8 : f32 to vector<16x256xf32>
    %13 = arith.maximumf %11, %12 : vector<16x256xf32>
    %c0_9 = arith.constant 0 : index
    %c0_10 = arith.constant 0 : index
    %14 = vector.load %arg6[%c0_9, %c0_10] : memref<16x256xf32, #tpu.memory_space<vmem>>, vector<16x256xf32>
    %15 = arith.mulf %13, %14 : vector<16x256xf32>
    %c0_11 = arith.constant 0 : index
    %c0_12 = arith.constant 0 : index
    %16 = vector.load %arg7[%c0_11, %c0_12] : memref<16x256xf32, #tpu.memory_space<vmem>>, vector<16x256xf32>
    tpu.vector_store %arg7[%c0_11, %c0_12], %15 {strides = array<i32>} : memref<16x256xf32, #tpu.memory_space<vmem>>, vector<16x256xf32>,
    return
  }
  func.func @transform_0(%arg0: i32, %arg1: i32) -> (i32, i32) {
    %c0_i32 = arith.constant 0 : i32
    %c0_i32_0 = arith.constant 0 : i32
    %c0_i32_1 = arith.constant 0 : i32
    return %c0_i32, %c0_i32_0 : i32, i32
  }
  func.func @transform_1(%arg0: i32, %arg1: i32) -> (i32, i32) {
    %c0_i32 = arith.constant 0 : i32
    %c0_i32_0 = arith.constant 0 : i32
    return %c0_i32, %arg1 : i32, i32
  }
  func.func @transform_2(%arg0: i32, %arg1: i32) -> (i32, i32) {
    %c0_i32 = arith.constant 0 : i32
    %c0_i32_0 = arith.constant 0 : i32
    return %c0_i32, %arg1 : i32, i32
  }
  func.func @transform_3(%arg0: i32, %arg1: i32) -> (i32, i32) {
    %c0_i32 = arith.constant 0 : i32
    %c0_i32_0 = arith.constant 0 : i32
    return %arg0, %c0_i32 : i32, i32
  }
  func.func @transform_4(%arg0: i32, %arg1: i32) -> (i32, i32) {
    %c0_i32 = arith.constant 0 : i32
    return %arg0, %arg1 : i32, i32
  }
  func.func @transform_5(%arg0: i32, %arg1: i32) -> (i32, i32) {
    %c0_i32 = arith.constant 0 : i32
    return %arg0, %arg1 : i32, i32
  }
}

</mosaic_0001>

<bundles_post_ra>
// kernel: tpu_custom_call.1
= control target key start
LH: loop header
LB: loop body
LE: loop exit
PB: predicated region body
PF: predicated region fallthrough
CT: control target
= control target key end

     0   :  { %10 = vsyncpa [#allocation5], 0  ;;  %s557_s0 = inlined_call_operand.hbm [shape: f32[16,128], index: 0, kind: input, shape index: {}]   ;;  %s558_s1 = inlined_call_operand.hbm [shape: f32[128,256], index: 1, kind: input, shape index: {}]   ;;  %s559_s2 = inlined_call_operand.vmem [shape: f32[1,256], index: 2, kind: input, shape index: {}]   ;;  %s560_s3 = inlined_call_operand.hbm [shape: f32[16,16], index: 3, kind: input, shape index: {}]   ;;  %s561_s4 = inlined_call_operand.hbm [shape: f32[16,256], index: 4, kind: input, shape index: {}]   ;;  %s562_s5 = inlined_call_operand.hbm [shape: f32[16,256], index: 5, kind: output, shape index: {}]  }
   0x1   :  { %11 = vsyncpa [#allocation8], 0 }
   0x2   :  { %12 = vsyncpa [#allocation11], 0 }
   0x3   :  { %13 = vsyncpa [#allocation6], 0  ;;  %s485_s18 = smov [#allocation7]  }
   0x4   :  { %s31_s19 = sshll.u32 %s485_s18, 4  ;;  %s32_s19 = int_to_ptr.vmem [resolvable:$true] %s31_s19 }
   0x5   :  { %s385_s20 = scalar_lea.vmem %s32_s19, 4096  ;;  %p390_p1 = scmp.lt.s32.totalorder %s32_s19, %s32_s19 }
   0x6   :  { %p386_p0 = scmp.ne.s32.totalorder %s32_s19, %s385_s20  ;;  %p391_p2 = scmp.lt.s32.totalorder %s385_s20, %s385_s20 }
   0x8   :  { %p392_p3 = por %p391_p2, %p390_p1 }
   0xa   :  { %p393_p4 = pnand %p392_p3, %p386_p0 }
   0xc   :  { %396 = shalt.err (!%p393_p4)
}
   0xd   :  { %s486_s21 = smov 256   ;;  %s487_s22 = smov 16  }
   0xe   :  { %37 = dma.hbm_to_vmem [thread:$0]  %s558_s1, 4096, %s32_s19, [#allocation8], %s486_s21, %s486_s21, %s487_s22  }
   0xf   :  { %s488_s25 = smov [#allocation4]  }
  0x10   :  { %s19_s26 = sshll.u32 %s488_s25, 4  ;;  %s20_s26 = int_to_ptr.vmem [resolvable:$true] %s19_s26 }
  0x11   :  { %s405_s27 = scalar_lea.vmem %s20_s26, 256  ;;  %p410_p6 = scmp.lt.s32.totalorder %s20_s26, %s20_s26 }
  0x12   :  { %p406_p5 = scmp.ne.s32.totalorder %s20_s26, %s405_s27  ;;  %p411_p7 = scmp.lt.s32.totalorder %s405_s27, %s405_s27 }
  0x14   :  { %p412_p8 = por %p411_p7, %p410_p6 }
  0x16   :  { %p413_p9 = pnand %p412_p8, %p406_p5 }
  0x18   :  { %416 = shalt.err (!%p413_p9)
}
  0x19   :  { %s489_s28 = smov 128   ;;  %s490_s29 = smov 8  }
  0x1a   :  { %25 = dma.hbm_to_vmem [thread:$0]  %s557_s0, 256, %s20_s26, [#allocation5], %s489_s28, %s489_s28, %s490_s29  }
  0x1b   :  { %s491_s7 = smov [#allocation9]   ;;  %s492_s9 = smov [#allocation10]  }
  0x1c   :  { %s45_s8 = sshll.u32 %s491_s7, 4  ;;  %s57_s1 = sshll.u32 %s492_s9, 4  ;;  %s46_s8 = int_to_ptr.vmem [resolvable:$true] %s45_s8  ;;  %s58_s1 = int_to_ptr.vmem [resolvable:$true] %s57_s1 }
  0x1d   :  { %s425_s10 = scalar_lea.vmem %s46_s8, 256  ;;  %p430_p11 = scmp.lt.s32.totalorder %s46_s8, %s46_s8 }
  0x1e   :  { %p426_p10 = scmp.ne.s32.totalorder %s46_s8, %s425_s10  ;;  %p431_p12 = scmp.lt.s32.totalorder %s425_s10, %s425_s10 }
  0x20   :  { %p432_p13 = por %p431_p12, %p430_p11 }
  0x22   :  { %p433_p0 = pnand %p432_p13, %p426_p10 }
  0x24   :  { %436 = shalt.err (!%p433_p0)
}
  0x25   :  { %51 = dma.hbm_to_vmem [thread:$0]  %s560_s3, 256, %s46_s8, [#allocation8], %s489_s28, %s489_s28, %s490_s29  }
  0x26   :  { %s445_s13 = scalar_lea.vmem %s58_s1, 512  ;;  %p450_p2 = scmp.lt.s32.totalorder %s58_s1, %s58_s1 }
  0x27   :  { %p446_p1 = scmp.ne.s32.totalorder %s58_s1, %s445_s13  ;;  %p451_p3 = scmp.lt.s32.totalorder %s445_s13, %s445_s13 }
  0x29   :  { %p452_p4 = por %p451_p3, %p450_p2 }
  0x2b   :  { %p453_p5 = pnand %p452_p4, %p446_p1 }
  0x2d   :  { %456 = shalt.err (!%p453_p5)
}
  0x2e   :  { %63 = dma.hbm_to_vmem [thread:$0]  %s561_s4, 512, %s58_s1, [#allocation11], %s486_s21, %s486_s21, %s487_s22  }
  0x2f   :  { %477 = dma.done.wait [#allocation5], 256  }
  0x30   :  { %478 = vsyncadd [#allocation5], 4294967040 }
  0x31   :  { %479 = dma.done.wait [#allocation8], 4352  }
  0x32   :  { %480 = vsyncadd [#allocation8], 4294962944 }
  0x33   :  { %481 = dma.done.wait [#allocation11], 512  }
  0x34   :  { %482 = vsyncadd [#allocation11], 4294966784  ;;  %vm84_vm0 = vcmask 130048   ;;  %v83_v0 = vld [vmem:[#allocation4 + $0x8] sm:$0xff]  ;;  %v82_v1 = vld [vmem:[#allocation4] sm:$0xff]  ;;  %v493_v38 = vmov 0.0   ;;  %v225_v46 = vlaneseq }
  0x35   :  { %v80_v2 = vld [vmem:[#allocation9] sm:$0xff]  ;;  %357 = vmatprep.subr.mxu0 %v83_v0  ;;  %v210_v4 = vld [vmem:[#allocation7 + $0xf8] sm:$0xff]  ;;  %v209_v5 = vld [vmem:[#allocation7 + $0xf0] sm:$0xff]  ;;  %303 = vmatprep.mubr.f32.mxu1 %v493_v38  ;;  %v494_v39 = vmov 0   ;;  %vm174_vm1 = vcmask 7168  }
  0x36   :  { %361 = vmatprep.mubr.msk.f32.mxu0 %vm84_vm0, %v80_v2  ;;  %v168_v3 = vsel %vm84_vm0, %v80_v2, 0.0  ;;  %358 = vmatpush3.msra.mxu0 %v83_v0  ;;  %v81_v6 = vld [vmem:[#allocation9 + $0x8] sm:$0xff]  ;;  %v207_v9 = vld [vmem:[#allocation7 + $0xe0] sm:$0xff]  ;;  %v206_v10 = vld [vmem:[#allocation7 + $0xd8] sm:$0xff]  ;;  %v226_v47 = vshrl.u32 %v225_v46, 7 }
  0x37   :  { %169 = vadd.xlane.f32.xlu0 %v168_v3  ;;  %v208_v7 = vld [vmem:[#allocation7 + $0xe8] sm:$0xff]  ;;  %359 = vmatprep.subr.mxu0 %v82_v1  ;;  %v171_v8 = vsel %vm84_vm0, %v81_v6, 0.0  ;;  %v205_v11 = vld [vmem:[#allocation7 + $0xd0] sm:$0xff]  ;;  %v203_v13 = vld [vmem:[#allocation7 + $0xc0] sm:$0xff] }
  0x38   :  { %239 = vmatprep.subr.mxu1 %v210_v4  ;;  %360 = vmatpush3.msra.mxu0 %v82_v1  ;;  %v204_v12 = vld [vmem:[#allocation7 + $0xc8] sm:$0xff]  ;;  %v202_v14 = vld [vmem:[#allocation7 + $0xb8] sm:$0xff]  ;;  %v201_v15 = vld [vmem:[#allocation7 + $0xb0] sm:$0xff]  ;;  %v227_v48 = vsub.s32 0, %v226_v47  ;;  %v231_v50 = vsub.s32 1, %v226_v47 }
  0x39   :  { %240 = vmatpush1.msra.mxu1 %v209_v5  ;;  %362 = vmatmul.mubr.msk.f32.vlgmr.msra.gmra.mxu0 %vm84_vm0, %v81_v6  ;;  %v200_v16 = vld [vmem:[#allocation7 + $0xa8] sm:$0xff]  ;;  %v199_v17 = vld [vmem:[#allocation7 + $0xa0] sm:$0xff]  ;;  %v198_v18 = vld [vmem:[#allocation7 + $0x98] sm:$0xff] }
  0x3a   :  { %241 = vmatprep.subr.mxu1 %v208_v7  ;;  %v197_v19 = vld [vmem:[#allocation7 + $0x90] sm:$0xff]  ;;  %v196_v20 = vld [vmem:[#allocation7 + $0x88] sm:$0xff]  ;;  %v195_v21 = vld [vmem:[#allocation7 + $0x80] sm:$0xff]  ;;  %375 = vset.pattern.permute.xlu1 %v494_v39 }
  0x3b   :  { %172 = vadd.xlane.f32.xlu0 %v171_v8  ;;  %242 = vmatpush1.msra.mxu1 %v207_v9  ;;  %v194_v22 = vld [vmem:[#allocation7 + $0x78] sm:$0xff]  ;;  %v193_v23 = vld [vmem:[#allocation7 + $0x70] sm:$0xff]  ;;  %v192_v24 = vld [vmem:[#allocation7 + $0x68] sm:$0xff] }
  0x3c   :  { %243 = vmatprep.subr.mxu1 %v206_v10  ;;  %v191_v25 = vld [vmem:[#allocation7 + $0x60] sm:$0xff]  ;;  %v190_v26 = vld [vmem:[#allocation7 + $0x58] sm:$0xff]  ;;  %v189_v27 = vld [vmem:[#allocation7 + $0x50] sm:$0xff]  ;;  %376 = vset.pattern.permute.xlu0 %v494_v39 }
  0x3d   :  { %244 = vmatpush1.msra.mxu1 %v205_v11  ;;  %v188_v28 = vld [vmem:[#allocation7 + $0x48] sm:$0xff]  ;;  %v187_v29 = vld [vmem:[#allocation7 + $0x40] sm:$0xff]  ;;  %v186_v30 = vld [vmem:[#allocation7 + $0x38] sm:$0xff] }
  0x3e   :  { %245 = vmatprep.subr.mxu1 %v204_v12  ;;  %v185_v31 = vld [vmem:[#allocation7 + $0x30] sm:$0xff]  ;;  %v184_v32 = vld [vmem:[#allocation7 + $0x28] sm:$0xff]  ;;  %v183_v33 = vld [vmem:[#allocation7 + $0x20] sm:$0xff] }
  0x3f   :  { %246 = vmatpush1.msra.mxu1 %v203_v13  ;;  %v182_v34 = vld [vmem:[#allocation7 + $0x18] sm:$0xff]  ;;  %v181_v35 = vld [vmem:[#allocation7 + $0x10] sm:$0xff]  ;;  %v180_v36 = vld [vmem:[#allocation7 + $0x8] sm:$0xff] }
  0x40   :  { %247 = vmatprep.subr.mxu1 %v202_v14  ;;  %v179_v37 = vld [vmem:[#allocation7] sm:$0xff]  ;;  %v320_v59 = vld [vmem:[#allocation10] sm:$0xff]  ;;  %v321_v0 = vld [vmem:[#allocation10 + $0x8] sm:$0xff] }
  0x41   :  { %248 = vmatpush1.msra.mxu1 %v201_v15  ;;  %v213_v49 = vld [vmem:[%s559_s2] sm:$0x3]  ;;  %v323_v11 = vld [vmem:[#allocation10 + $0x18] sm:$0xff]  ;;  %s495_s2 = smov [#allocation12]  }
  0x42   :  { %249 = vmatprep.subr.mxu1 %v200_v16  ;;  %v228_v51 = vrot.slane %v213_v49, %v227_v48  ;;  %v232_v53 = vrot.slane %v213_v49, %v231_v50  ;;  %v322_v6 = vld [vmem:[#allocation10 + $0x10] sm:$0xff]  ;;  %s337_s15 = sshll.u32 %s495_s2, 4  ;;  %s338_s15 = int_to_ptr.vmem [resolvable:$true] %s337_s15 }
  0x43   :  { %250 = vmatpush1.msra.mxu1 %v199_v17  ;;  %s457_s16 = scalar_lea.vmem %s338_s15, 512  ;;  %p462_p7 = scmp.lt.s32.totalorder %s338_s15, %s338_s15 }
  0x44   :  { %251 = vmatprep.subr.mxu1 %v198_v18  ;;  %p458_p6 = scmp.ne.s32.totalorder %s338_s15, %s457_s16  ;;  %p463_p8 = scmp.lt.s32.totalorder %s457_s16, %s457_s16 }
  0x45   :  { %252 = vmatpush1.msra.mxu1 %v197_v19 }
  0x46   :  { %253 = vmatprep.subr.mxu1 %v196_v20  ;;  %p464_p9 = por %p463_p8, %p462_p7 }
  0x47   :  { %254 = vmatpush1.msra.mxu1 %v195_v21 }
  0x48   :  { %255 = vmatprep.subr.mxu1 %v194_v22  ;;  %p465_p10 = pnand %p464_p9, %p458_p6 }
  0x49   :  { %256 = vmatpush1.msra.mxu1 %v193_v23 }
  0x4a   :  { %257 = vmatprep.subr.mxu1 %v192_v24 }
  0x4b   :  { %258 = vmatpush1.msra.mxu1 %v191_v25 }
  0x4c   :  { %259 = vmatprep.subr.mxu1 %v190_v26 }
  0x4d   :  { %260 = vmatpush1.msra.mxu1 %v189_v27 }
  0x4e   :  { %261 = vmatprep.subr.mxu1 %v188_v28 }
  0x4f   :  { %262 = vmatpush1.msra.mxu1 %v187_v29 }
  0x50   :  { %263 = vmatprep.subr.mxu1 %v186_v30 }
  0x51   :  { %264 = vmatpush1.msra.mxu1 %v185_v31 }
  0x52   :  { %265 = vmatprep.subr.mxu1 %v184_v32 }
  0x53   :  { %266 = vmatpush1.msra.mxu1 %v183_v33 }
  0x54   :  { %267 = vmatprep.subr.mxu1 %v182_v34 }
  0x55   :  { %268 = vmatpush1.msra.mxu1 %v181_v35 }
  0x56   :  { %269 = vmatprep.subr.mxu1 %v180_v36 }
  0x57   :  { %270 = vmatpush1.msra.mxu1 %v179_v37 }
  0xc0   :  { %v170_v40 = vpop.xlane.xlu0 %169 }
  0xc1   :  { %175 = vst.msk [vmem:[#allocation3] sm:$0xff] %vm174_vm1, %v170_v40 }
  0xc4   :  { %v173_v41 = vpop.xlane.xlu0 %172 }
  0xc5   :  { %176 = vst.msk [vmem:[#allocation3 + $0x8] sm:$0xff] %vm174_vm1, %v173_v41 }
  0xc8   :  { %v211_v42 = vld [vmem:[#allocation3] sm:$0xff] }
  0xc9   :  { %216 = vperm.xlu1 %375, %v211_v42  }
  0xcc   :  { %v212_v43 = vld [vmem:[#allocation3 + $0x8] sm:$0xff] }
  0xcd   :  { %221 = vperm.xlu1 %375, %v212_v43  }
  0xf9   :  { %v363_v44 = vpop.f32.mrf.mxu0 }
  0xfb   :  { %v157_v45 = vpop.f32.mrf.mxu0 }
  0xfc   :  { %304 = vmatmul.mubr.f32.vlgmr.msra.gmra.mxu1 %v157_v45 }
  0xfd   :  { %309 = vmatprep.mubr.f32.mxu1 %v493_v38 }
 0x100   :  { %310 = vmatmul.mubr.f32.gmra.mxu1 %v363_v44 }
 0x144   :  { %v217_v52 = vpop.permute.xlu1 %216 }
 0x145   :  { %v235_v54 = vmul.f32 %v228_v51, %v217_v52  ;;  %v236_v55 = vmul.f32 %v232_v53, %v217_v52 }
 0x148   :  { %v222_v56 = vpop.permute.xlu1 %221 }
 0x149   :  { %v237_v61 = vmul.f32 %v228_v51, %v222_v56  ;;  %v238_v2 = vmul.f32 %v232_v53, %v222_v56 }
 0x1bc   :  { %v305_v57 = vpop.f32.mrf.mxu1 }
 0x1bd   :  { %v306_v58 = vadd.f32 %v305_v57, %v235_v54 }
 0x1be   :  { %v307_v60 = vpop.f32.mrf.mxu1 }
 0x1bf   :  { %v316_v62 = vmax.f32 %v306_v58, 0.0  ;;  %v308_v63 = vadd.f32 %v307_v60, %v236_v55 }
 0x1c0   :  { %v311_v1 = vpop.f32.mrf.mxu1 }
 0x1c1   :  { %v324_v3 = vmul.f32 %v320_v59, %v316_v62  ;;  %v317_v4 = vmax.f32 %v308_v63, 0.0  ;;  %v312_v5 = vadd.f32 %v311_v1, %v237_v61 }
 0x1c2   :  { %v313_v7 = vpop.f32.mrf.mxu1 }
 0x1c3   :  { %328 = vst [vmem:[#allocation12] sm:$0xff] %v324_v3  ;;  %v325_v8 = vmul.f32 %v321_v0, %v317_v4  ;;  %v318_v9 = vmax.f32 %v312_v5, 0.0  ;;  %v314_v10 = vadd.f32 %v313_v7, %v238_v2 }
 0x1c5   :  { %329 = vst [vmem:[#allocation12 + $0x8] sm:$0xff] %v325_v8  ;;  %v326_v12 = vmul.f32 %v322_v6, %v318_v9  ;;  %v319_v13 = vmax.f32 %v314_v10, 0.0 }
 0x1c7   :  { %330 = vst [vmem:[#allocation12 + $0x10] sm:$0xff] %v326_v12  ;;  %v327_v14 = vmul.f32 %v323_v11, %v319_v13 }
 0x1c9   :  { %331 = vst [vmem:[#allocation12 + $0x18] sm:$0xff] %v327_v14 }
 0x1ca   :  { %468 = shalt.err (!%p465_p10)
}
 0x1cb   :  { %343 = dma.vmem_to_hbm [thread:$0]  %s338_s15, 512, %s562_s5, [#allocation6], %s486_s21, %s486_s21, %s487_s22  }
 0x1cc   :  { %483 = dma.done.wait [#allocation6], 512  }
 0x1cd   :  { %484 = vsyncadd [#allocation6], 4294966784 }
 0x1ce   :  { %347 = vsyncpa [#allocation5], 1 }
 0x1cf   :  { %348 = vsyncpa [#allocation8], 1 }
 0x1d0   :  { %349 = vsyncpa [#allocation11], 1 }
 0x1d1   :  { %350 = vsyncpa [#allocation6], 1 }

</bundles_post_ra>
